<compile_context>
chip_gen: v7x
topology: tpu7x:2x2x1
jax: 0.10.0
libtpu: 0.0.40
codegen_flags: <defaults>
</compile_context>

<pallas_src>
import functools

import jax
import jax.numpy as jnp
from jax.experimental import pallas as pl
from jax.experimental.pallas import tpu as pltpu


_SQRT1_2 = 0.7071067811865476
# Abramowitz & Stegun 7.1.26 rational approximation of erf, |error| <= 1.5e-7.
_ERF_P = 0.3275911
_ERF_A1 = 0.254829592
_ERF_A2 = -0.284496736
_ERF_A3 = 1.421413741
_ERF_A4 = -1.453152027
_ERF_A5 = 1.061405429


def _erf(x):
    """erf from exp/mul/add/select only (always lowers in Mosaic); the
    1.5e-7 max error keeps exact-GELU (torch.nn.GELU default) semantics."""
    s = jnp.where(x < 0.0, -1.0, 1.0)
    a = jnp.abs(x)
    t = 1.0 / (1.0 + _ERF_P * a)
    poly = t * (_ERF_A1 + t * (_ERF_A2 + t * (_ERF_A3 + t * (_ERF_A4 + t * _ERF_A5))))
    return s * (1.0 - poly * jnp.exp(-a * a))


def _bottom_up_mixing_kernel(x_ref, s_ref, p_ref, gamma_ref, w_ref, b_ref,
                             o_ref, *, eps: float, mxu_dtype):
    # x_ref:     (L_in, Nblk)   input block; column c = (batch b, hidden h)
    # s_ref:     (Nblk, Bblk)   group-averaging matrix (entries 1/H)
    # p_ref:     (Bblk, Nblk)   0/1 group-broadcast matrix
    # gamma_ref: (1, Nblk)      LayerNorm gamma tiled across the batch groups
    # w_ref:     (L_out, L_in)  W_eff = W - rowsum(W)/L_in (seq-mean folded in)
    # b_ref:     (L_out, 1)     temporal Linear bias
    # o_ref:     (L_out, Nblk)  output block (lane-dense store)
    f32 = jnp.float32
    hi = jax.lax.Precision.HIGHEST

    x = x_ref[...].astype(f32)
    s = s_ref[...]
    p = p_ref[...]

    def mm_big(a, b):
        # Contraction-heavy matmuls: optionally bf16 operands, f32 accumulate.
        if mxu_dtype is not None:
            return jnp.dot(a.astype(mxu_dtype), b.astype(mxu_dtype),
                           preferred_element_type=f32)
        return jnp.dot(a, b, preferred_element_type=f32, precision=hi)

    def mm_bcast(a, b):
        # 0/1 broadcast matmuls stay f32 (exact, tiny contraction dim).
        return jnp.dot(a, b, preferred_element_type=f32, precision=hi)

    # --- LayerNorm-over-H statistics via factored group matmuls (MXU) ---
    mu_g = mm_big(x, s)                                    # (L_in, Bblk)
    mu = mm_bcast(mu_g, p)                                 # (L_in, Nblk)
    xc = x - mu
    var_g = mm_big(xc * xc, s)                             # biased variance
    scale = mm_bcast(jax.lax.rsqrt(var_g + eps), p)        # (L_in, Nblk)
    xn = xc * scale                                        # gamma/beta deferred

    # --- temporal Linear along seq: one fat MXU matmul (seq-mean folded) ---
    z = mm_big(w_ref[...], xn)                             # (L_out, Nblk)
    y = gamma_ref[...] * z + b_ref[...]

    # --- exact-erf GELU (parity with torch.nn.GELU() default) ---
    y = 0.5 * y * (1.0 + _erf(y * _SQRT1_2))

    o_ref[...] = y.astype(o_ref.dtype)


def _vmem_budget_and_limit():
    """Per-generation block budget and scoped-VMEM limit.
    v5e/v6e: 128 MiB VMEM -> bigger blocks; v7x (64 MiB) or unknown: stay
    within the 32 MiB scoped default."""
    cap = None
    try:
        cap = getattr(pltpu.get_tpu_info(), "vmem_capacity_bytes", None)
    except Exception:
        cap = None
    if cap is not None and cap >= (100 << 20):
        return 48 << 20, 96 << 20
    return 12 << 20, 32 << 20


def _pick_block_batch(B, L_in, L_out, H, *, vmem_budget, itemsize=4):
    """Largest legal divisor of B whose footprint fits the budget.
    Legal := bblk*H is a multiple of 128 lanes, or the block spans the full
    width (so the BlockSpec never violates the (8,128) rule).  Prefers a grid
    of >= 2 blocks (v7x megacore) when the tile stays >= 512 lanes wide."""

    def legal(d):
        return d == B or (d * H) % 128 == 0

    def footprint(d):
        n = d * H
        io = 2 * (L_in + L_out) * n * itemsize                 # dbl-buffered x/out
        consts = (2 * n * d + n + L_out * L_in + L_out) * 4    # S,P,gamma,W,b (Buffered(1))
        temps = (6 * L_in * n + 3 * L_in * d) * 4              # in-kernel f32 temporaries
        return io + consts + temps

    divisors = [d for d in range(1, B + 1) if B % d == 0 and legal(d)]
    fitting = [d for d in divisors if footprint(d) <= vmem_budget]
    if fitting:
        multi = [d for d in fitting if B // d >= 2 and d * H >= 512]
        if multi:
            return max(multi)
        return max(fitting)
    # Nothing fits the budget: fall back to the smallest *legal* block so
    # lowering stays valid (compiler may need the full vmem_limit).
    return min(divisors)


def bottom_up_mixing(x, gamma, beta, w, b, *, eps: float = 1e-5,
                     mxu_dtype=None, allow_input_fusion=True):
    """x: (B, L_in, H); w: (L_out, L_in); b: (L_out,); gamma/beta: (H,).

    `beta` is accepted for API parity but cancels exactly in the fused
    (LayerNorm -> seq-mean-subtract -> temporal Linear) algebra.  Set
    mxu_dtype=jnp.bfloat16 to run the contraction-heavy matmuls with bf16
    operands (f32 accumulation) on any generation; LN statistics and all
    elementwise math always stay f32.
    """
    B, L_in, H = x.shape
    L_out = w.shape[0]
    del beta  # cancels exactly against the seq-mean subtraction

    vmem_budget, vmem_limit = _vmem_budget_and_limit()
    bblk = _pick_block_batch(B, L_in, L_out, H, vmem_budget=vmem_budget)
    nblk = bblk * H
    n_total = B * H

    # Fold batch into the lane axis: kernel sees lane-dense (L_in, B*H) blocks
    # and runs ONE fat temporal matmul.  allow_input_fusion lets XLA fuse this
    # relayout into the Pallas operand instead of an extra HBM pass.
    # TODO(synk): expose the (L_out, B*H) layout directly to fused consumers
    # to also drop the output un-fold below.
    x2 = jnp.transpose(x, (1, 0, 2)).reshape(L_in, n_total)

    # Factored group-statistics matrices (same for every batch block since the
    # group pattern repeats with period H inside a block).
    grp = jnp.arange(nblk) // H                     # group id of each lane
    col = jnp.arange(bblk)
    s_mat = (grp[:, None] == col[None, :]).astype(jnp.float32) / H   # (Nblk, Bblk)
    p_mat = (col[:, None] == grp[None, :]).astype(jnp.float32)       # (Bblk, Nblk)

    gamma_blk = jnp.tile(gamma.astype(jnp.float32), bblk).reshape(1, nblk)
    w32 = w.astype(jnp.float32)
    # Fold the seq-mean subtraction into the weight: W_eff = W - rowsum(W)/L_in.
    w_eff = w32 - jnp.sum(w32, axis=1, keepdims=True) / L_in
    b2 = b.reshape(L_out, 1).astype(jnp.float32)

    kernel = functools.partial(_bottom_up_mixing_kernel, eps=eps,
                               mxu_dtype=mxu_dtype)

    const = dict(pipeline_mode=pl.Buffered(1))      # grid-invariant operands
    out2 = pl.pallas_call(
        kernel,
        out_shape=jax.ShapeDtypeStruct((L_out, n_total), x.dtype),
        grid=(n_total // nblk,),
        in_specs=[
            pl.BlockSpec((L_in, nblk), lambda i: (0, i)),            # x (lane-dense)
            pl.BlockSpec((nblk, bblk), lambda i: (0, 0), **const),   # S
            pl.BlockSpec((bblk, nblk), lambda i: (0, 0), **const),   # P
            pl.BlockSpec((1, nblk), lambda i: (0, 0), **const),      # gamma (tiled)
            pl.BlockSpec((L_out, L_in), lambda i: (0, 0), **const),  # W_eff
            pl.BlockSpec((L_out, 1), lambda i: (0, 0), **const),     # bias
        ],
        out_specs=pl.BlockSpec((L_out, nblk), lambda i: (0, i)),
        compiler_params=pltpu.CompilerParams(
            dimension_semantics=("parallel",),       # megacore split on v7x
            vmem_limit_bytes=vmem_limit,
            allow_input_fusion=(
                (True, False, False, False, False, False)
                if allow_input_fusion else None),
        ),
    )(x2, s_mat, p_mat, gamma_blk, w_eff, b2)

    # Back to the module's (B, L_out, H) layout.
    return out2.reshape(L_out, B, H).transpose(1, 0, 2)


def bottom_up_mixing_ref(x, gamma, beta, w, b, *, eps: float = 1e-5):
    """Pure-JAX reference mirroring the PyTorch forward."""
    mu = jnp.mean(x, axis=-1, keepdims=True)
    var = jnp.mean((x - mu) ** 2, axis=-1, keepdims=True)
    x_hat = (x - mu) / jnp.sqrt(var + eps) * gamma + beta
    x_hat = x_hat - jnp.mean(x_hat, axis=1, keepdims=True)
    # temporal linear acts on the seq axis: (B, H, L_in) @ W^T -> (B, H, L_out)
    y = jnp.einsum("blh,ol->boh", x_hat, w,
                   precision=jax.lax.Precision.HIGHEST) + b[None, :, None]
    return 0.5 * y * (1.0 + jax.lax.erf(y / jnp.sqrt(2.0)))


if __name__ == "__main__":
    fn = jax.jit(bottom_up_mixing)

    def _check(B, L_in, L_out, H, key):
        kx, kw, kb, kg, kbe = jax.random.split(key, 5)
        x = jax.random.normal(kx, (B, L_in, H), dtype=jnp.float32)
        w = jax.random.normal(kw, (L_out, L_in), dtype=jnp.float32) * 0.1
        b = jax.random.normal(kb, (L_out,), dtype=jnp.float32) * 0.01
        gamma = 1.0 + 0.05 * jax.random.normal(kg, (H,), dtype=jnp.float32)
        beta = 0.05 * jax.random.normal(kbe, (H,), dtype=jnp.float32)

        out = jax.block_until_ready(fn(x, gamma, beta, w, b))
        ref = bottom_up_mixing_ref(x, gamma, beta, w, b)
        assert out.shape == (B, L_out, H)
        err = float(jnp.max(jnp.abs(out - ref)))
        assert jnp.allclose(out, ref, atol=2e-4, rtol=2e-4), err

    root = jax.random.PRNGKey(0)
    k1, k2 = jax.random.split(root)
    # Small shapes implied by the module: batch=2, input_len=16, output_len=8,
    # hidden_dim=32 ...
    _check(2, 16, 8, 32, k1)
    # ... plus a lane-aligned case that exercises grid > 1 (megacore path).
    _check(8, 16, 8, 128, k2)

    print("KERNEL_OK")
</pallas_src>

<mosaic_0001>
module attributes {stable_mosaic.version = 11 : i64} {
  func.func @_bottom_up_mixing_kernel(%arg0: i32, %arg1: memref<16x64xf32, #tpu.memory_space<vmem>>, %arg2: memref<64x2xf32, #tpu.memory_space<vmem>>, %arg3: memref<2x64xf32, #tpu.memory_space<vmem>>, %arg4: memref<1x64xf32, #tpu.memory_space<vmem>>, %arg5: memref<8x16xf32, #tpu.memory_space<vmem>>, %arg6: memref<8x1xf32, #tpu.memory_space<vmem>>, %arg7: memref<8x64xf32, #tpu.memory_space<vmem>>) attributes {dimension_semantics = [#tpu.dimension_semantics<parallel>], iteration_bounds = array<i64: 1>, scalar_prefetch = 0 : i64, scratch_operands = 0 : i64, tpu.core_type = #tpu.core_type<tc>, window_params = [{transform_indices = @transform_0, window_bounds = array<i64: 16, 64>}, {pipeline_mode = #tpu.pipeline_mode<synchronous>, transform_indices = @transform_1, window_bounds = array<i64: 64, 2>}, {pipeline_mode = #tpu.pipeline_mode<synchronous>, transform_indices = @transform_2, window_bounds = array<i64: 2, 64>}, {pipeline_mode = #tpu.pipeline_mode<synchronous>, transform_indices = @transform_3, window_bounds = array<i64: 1, 64>}, {pipeline_mode = #tpu.pipeline_mode<synchronous>, transform_indices = @transform_4, window_bounds = array<i64: 8, 16>}, {pipeline_mode = #tpu.pipeline_mode<synchronous>, transform_indices = @transform_5, window_bounds = array<i64: 8, 1>}, {transform_indices = @transform_6, window_bounds = array<i64: 8, 64>}]} {
    %c0 = arith.constant 0 : index
    %c0_0 = arith.constant 0 : index
    %0 = vector.load %arg1[%c0, %c0_0] : memref<16x64xf32, #tpu.memory_space<vmem>>, vector<16x64xf32>
    %c0_1 = arith.constant 0 : index
    %c0_2 = arith.constant 0 : index
    %1 = vector.load %arg2[%c0_1, %c0_2] : memref<64x2xf32, #tpu.memory_space<vmem>>, vector<64x2xf32>
    %c0_3 = arith.constant 0 : index
    %c0_4 = arith.constant 0 : index
    %2 = vector.load %arg3[%c0_3, %c0_4] : memref<2x64xf32, #tpu.memory_space<vmem>>, vector<2x64xf32>
    %cst = arith.constant dense<0.000000e+00> : vector<16x2xf32>
    %3 = tpu.matmul %0, %1, %cst {dimension_numbers = #tpu.dot_dimension_numbers<[1], [0], [0], [1], [0, 0, 1, 1], [], []>, precision = #tpu.contract_precision<fp32>} : vector<16x64xf32>, vector<64x2xf32>, vector<16x2xf32> -> vector<16x2xf32>
    %cst_5 = arith.constant dense<0.000000e+00> : vector<16x64xf32>
    %4 = tpu.matmul %3, %2, %cst_5 {dimension_numbers = #tpu.dot_dimension_numbers<[1], [0], [0], [1], [0, 0, 1, 1], [], []>, precision = #tpu.contract_precision<fp32>} : vector<16x2xf32>, vector<2x64xf32>, vector<16x64xf32> -> vector<16x64xf32>
    %5 = arith.subf %0, %4 : vector<16x64xf32>
    %6 = arith.mulf %5, %5 : vector<16x64xf32>
    %cst_6 = arith.constant dense<0.000000e+00> : vector<16x2xf32>
    %7 = tpu.matmul %6, %1, %cst_6 {dimension_numbers = #tpu.dot_dimension_numbers<[1], [0], [0], [1], [0, 0, 1, 1], [], []>, precision = #tpu.contract_precision<fp32>} : vector<16x64xf32>, vector<64x2xf32>, vector<16x2xf32> -> vector<16x2xf32>
    %cst_7 = arith.constant 9.99999974E-6 : f32
    %8 = vector.broadcast %cst_7 : f32 to vector<16x2xf32>
    %9 = arith.addf %7, %8 : vector<16x2xf32>
    %10 = math.rsqrt %9 : vector<16x2xf32>
    %cst_8 = arith.constant dense<0.000000e+00> : vector<16x64xf32>
    %11 = tpu.matmul %10, %2, %cst_8 {dimension_numbers = #tpu.dot_dimension_numbers<[1], [0], [0], [1], [0, 0, 1, 1], [], []>, precision = #tpu.contract_precision<fp32>} : vector<16x2xf32>, vector<2x64xf32>, vector<16x64xf32> -> vector<16x64xf32>
    %12 = arith.mulf %5, %11 : vector<16x64xf32>
    %c0_9 = arith.constant 0 : index
    %c0_10 = arith.constant 0 : index
    %13 = vector.load %arg5[%c0_9, %c0_10] : memref<8x16xf32, #tpu.memory_space<vmem>>, vector<8x16xf32>
    %cst_11 = arith.constant dense<0.000000e+00> : vector<8x64xf32>
    %14 = tpu.matmul %13, %12, %cst_11 {dimension_numbers = #tpu.dot_dimension_numbers<[1], [0], [0], [1], [0, 0, 1, 1], [], []>, precision = #tpu.contract_precision<fp32>} : vector<8x16xf32>, vector<16x64xf32>, vector<8x64xf32> -> vector<8x64xf32>
    %c0_12 = arith.constant 0 : index
    %c0_13 = arith.constant 0 : index
    %15 = vector.load %arg4[%c0_12, %c0_13] : memref<1x64xf32, #tpu.memory_space<vmem>>, vector<1x64xf32>
    %16 = vector.broadcast %15 : vector<1x64xf32> to vector<8x64xf32>
    %17 = arith.mulf %16, %14 : vector<8x64xf32>
    %c0_14 = arith.constant 0 : index
    %c0_15 = arith.constant 0 : index
    %18 = vector.load %arg6[%c0_14, %c0_15] : memref<8x1xf32, #tpu.memory_space<vmem>>, vector<8x1xf32>
    %19 = vector.broadcast %18 : vector<8x1xf32> to vector<8x64xf32>
    %20 = arith.addf %17, %19 : vector<8x64xf32>
    %cst_16 = arith.constant 5.000000e-01 : f32
    %21 = vector.broadcast %cst_16 : f32 to vector<8x64xf32>
    %22 = arith.mulf %21, %20 : vector<8x64xf32>
    %cst_17 = arith.constant 0.707106769 : f32
    %23 = vector.broadcast %cst_17 : f32 to vector<8x64xf32>
    %24 = arith.mulf %20, %23 : vector<8x64xf32>
    %cst_18 = arith.constant 0.000000e+00 : f32
    %25 = vector.broadcast %cst_18 : f32 to vector<8x64xf32>
    %26 = arith.cmpf olt, %24, %25 : vector<8x64xf32>
    %cst_19 = arith.constant -1.000000e+00 : f32
    %cst_20 = arith.constant 1.000000e+00 : f32
    %27 = vector.broadcast %cst_19 : f32 to vector<8x64xf32>
    %28 = vector.broadcast %cst_20 : f32 to vector<8x64xf32>
    %29 = arith.select %26, %27, %28 : vector<8x64xi1>, vector<8x64xf32>
    %30 = math.absf %24 : vector<8x64xf32>
    %cst_21 = arith.constant 0.327591091 : f32
    %31 = vector.broadcast %cst_21 : f32 to vector<8x64xf32>
    %32 = arith.mulf %31, %30 : vector<8x64xf32>
    %cst_22 = arith.constant 1.000000e+00 : f32
    %33 = vector.broadcast %cst_22 : f32 to vector<8x64xf32>
    %34 = arith.addf %33, %32 : vector<8x64xf32>
    %cst_23 = arith.constant 1.000000e+00 : f32
    %35 = vector.broadcast %cst_23 : f32 to vector<8x64xf32>
    %36 = arith.divf %35, %34 : vector<8x64xf32>
    %cst_24 = arith.constant 1.06140542 : f32
    %37 = vector.broadcast %cst_24 : f32 to vector<8x64xf32>
    %38 = arith.mulf %36, %37 : vector<8x64xf32>
    %cst_25 = arith.constant -1.45315206 : f32
    %39 = vector.broadcast %cst_25 : f32 to vector<8x64xf32>
    %40 = arith.addf %39, %38 : vector<8x64xf32>
    %41 = arith.mulf %36, %40 : vector<8x64xf32>
    %cst_26 = arith.constant 1.42141378 : f32
    %42 = vector.broadcast %cst_26 : f32 to vector<8x64xf32>
    %43 = arith.addf %42, %41 : vector<8x64xf32>
    %44 = arith.mulf %36, %43 : vector<8x64xf32>
    %cst_27 = arith.constant -0.284496725 : f32
    %45 = vector.broadcast %cst_27 : f32 to vector<8x64xf32>
    %46 = arith.addf %45, %44 : vector<8x64xf32>
    %47 = arith.mulf %36, %46 : vector<8x64xf32>
    %cst_28 = arith.constant 0.254829586 : f32
    %48 = vector.broadcast %cst_28 : f32 to vector<8x64xf32>
    %49 = arith.addf %48, %47 : vector<8x64xf32>
    %50 = arith.mulf %36, %49 : vector<8x64xf32>
    %cst_29 = arith.constant 0.000000e+00 : f32
    %51 = vector.broadcast %cst_29 : f32 to vector<8x64xf32>
    %52 = arith.subf %51, %30 : vector<8x64xf32>
    %53 = arith.mulf %52, %30 : vector<8x64xf32>
    %54 = math.exp %53 : vector<8x64xf32>
    %55 = arith.mulf %50, %54 : vector<8x64xf32>
    %cst_30 = arith.constant 1.000000e+00 : f32
    %56 = vector.broadcast %cst_30 : f32 to vector<8x64xf32>
    %57 = arith.subf %56, %55 : vector<8x64xf32>
    %58 = arith.mulf %29, %57 : vector<8x64xf32>
    %cst_31 = arith.constant 1.000000e+00 : f32
    %59 = vector.broadcast %cst_31 : f32 to vector<8x64xf32>
    %60 = arith.addf %59, %58 : vector<8x64xf32>
    %61 = arith.mulf %22, %60 : vector<8x64xf32>
    %c0_32 = arith.constant 0 : index
    %c0_33 = arith.constant 0 : index
    %62 = vector.load %arg7[%c0_32, %c0_33] : memref<8x64xf32, #tpu.memory_space<vmem>>, vector<8x64xf32>
    tpu.vector_store %arg7[%c0_32, %c0_33], %61 {strides = array<i32>} : memref<8x64xf32, #tpu.memory_space<vmem>>, vector<8x64xf32>,
    return
  }
  func.func @transform_0(%arg0: i32) -> (i32, i32) {
    %c0_i32 = arith.constant 0 : i32
    %c0_i32_0 = arith.constant 0 : i32
    return %c0_i32, %arg0 : i32, i32
  }
  func.func @transform_1(%arg0: i32) -> (i32, i32) {
    %c0_i32 = arith.constant 0 : i32
    %c0_i32_0 = arith.constant 0 : i32
    %c0_i32_1 = arith.constant 0 : i32
    return %c0_i32, %c0_i32_0 : i32, i32
  }
  func.func @transform_2(%arg0: i32) -> (i32, i32) {
    %c0_i32 = arith.constant 0 : i32
    %c0_i32_0 = arith.constant 0 : i32
    %c0_i32_1 = arith.constant 0 : i32
    return %c0_i32, %c0_i32_0 : i32, i32
  }
  func.func @transform_3(%arg0: i32) -> (i32, i32) {
    %c0_i32 = arith.constant 0 : i32
    %c0_i32_0 = arith.constant 0 : i32
    %c0_i32_1 = arith.constant 0 : i32
    return %c0_i32, %c0_i32_0 : i32, i32
  }
  func.func @transform_4(%arg0: i32) -> (i32, i32) {
    %c0_i32 = arith.constant 0 : i32
    %c0_i32_0 = arith.constant 0 : i32
    %c0_i32_1 = arith.constant 0 : i32
    return %c0_i32, %c0_i32_0 : i32, i32
  }
  func.func @transform_5(%arg0: i32) -> (i32, i32) {
    %c0_i32 = arith.constant 0 : i32
    %c0_i32_0 = arith.constant 0 : i32
    %c0_i32_1 = arith.constant 0 : i32
    return %c0_i32, %c0_i32_0 : i32, i32
  }
  func.func @transform_6(%arg0: i32) -> (i32, i32) {
    %c0_i32 = arith.constant 0 : i32
    %c0_i32_0 = arith.constant 0 : i32
    return %c0_i32, %arg0 : i32, i32
  }
}

</mosaic_0001>

<bundles_post_ra>
// kernel: tile.8
= control target key start
LH: loop header
LB: loop body
LE: loop exit
PB: predicated region body
PF: predicated region fallthrough
CT: control target
= control target key end

     0   :  { %s22_s0 = inlined_call_operand.vmem [shape: f32[32], index: 0, kind: input, shape index: {}]   ;;  %s23_s1 = inlined_call_operand.vmem [shape: f32[2,32], index: 1, kind: output, shape index: {}]  }
   0x1   :  { %v4_v0 = vld [vmem:[%s22_s0] ss:$0 sm:$0xff] }
   0x2   :  { %5 = vst [vmem:[%s23_s1] sm:$0x3] %v4_v0 }

// kernel: tile.9
= control target key start
LH: loop header
LB: loop body
LE: loop exit
PB: predicated region body
PF: predicated region fallthrough
CT: control target
= control target key end

     0   :  { %vm7_vm0 = vcmask 261120   ;;  %vm13_vm1 = vcmask 523520   ;;  %s39_s0 = inlined_call_operand.vmem [shape: f32[2,32], index: 0, kind: input, shape index: {}]   ;;  %s40_s1 = inlined_call_operand.vmem [shape: f32[1,64], index: 1, kind: output, shape index: {}]  }
   0x1   :  { %v4_v0 = vld [vmem:[%s39_s0] sm:$0x3]  ;;  %s22_s0 = smov 32  }
   0x2   :  { %5 = vst [vmem:[#allocation1] sm:$0x3] %v4_v0 }
   0x9   :  { %v10_v1 = vld [vmem:[#allocation1 + $0x1] sm:$0x1]   ;;  %v6_v2 = vld [vmem:[#allocation1] sm:$0x1]  }
   0xa   :  { %11 = vrot.lane.b32.xlu0 %v10_v1, %s22_s0  ;;  %8 = vst.msk [vmem:[#allocation0] sm:$0x1] %vm7_vm0, %v6_v2  }
  0x7c   :  { %v12_v3 = vpop.permute.xlu0 %11  }
  0x7d   :  { %14 = vst.msk [vmem:[#allocation0] sm:$0x1] %vm13_vm1, %v12_v3  }
  0x84   :  { %v18_v4 = vld [vmem:[#allocation0] sm:$0x1] }
  0x85   :  { %20 = vst [vmem:[%s40_s1] sm:$0x1] %v18_v4 }

// kernel: bottom_up_mixing.1
= control target key start
LH: loop header
LB: loop body
LE: loop exit
PB: predicated region body
PF: predicated region fallthrough
CT: control target
= control target key end

     0   :  { %vm34_vm0 = vcmask 523264   ;;  %vm628_vm1 = vcmask 1041408   ;;  %vm621_vm2 = vcmask 15360   ;;  %vm3503_vm3 = vmmov 0   ;;  %s3878_s1 = inlined_call_operand.vmem [shape: f32[64,2], index: 1, kind: input, shape index: {}]   ;;  %s3879_s0 = inlined_call_operand.vmem [shape: f32[16,64], index: 0, kind: input, shape index: {}]   ;;  %s3880_s2 = inlined_call_operand.vmem [shape: f32[2,64], index: 2, kind: input, shape index: {}]   ;;  %s3881_s5 = inlined_call_operand.vmem [shape: f32[8,1], index: 5, kind: input, shape index: {}]   ;;  %s3882_s4 = inlined_call_operand.vmem [shape: f32[8,16], index: 4, kind: input, shape index: {}]   ;;  %s3883_s3 = inlined_call_operand.vmem [shape: f32[1,64], index: 3, kind: input, shape index: {}]   ;;  %s3884_s6 = inlined_call_operand.vmem [shape: f32[8,64], index: 6, kind: output, shape index: {}]  }
   0x1   :  { %v25_v0 = vld [vmem:[%s3878_s1] sm:$0xff]  ;;  %v26_v1 = vld [vmem:[%s3878_s1 + $0x8] sm:$0xff]  ;;  %v27_v2 = vld [vmem:[%s3878_s1 + $0x10] sm:$0xff]  ;;  %vm2211_vm4 = vcmask 130048  }
   0x2   :  { %v42_v3 = vand.u32 4294901760, %v25_v0  ;;  %v45_v4 = vand.u32 4294901760, %v26_v1  ;;  %v28_v5 = vld [vmem:[%s3878_s1 + $0x18] sm:$0xff]  ;;  %v48_v6 = vand.u32 4294901760, %v27_v2  ;;  %v29_v7 = vld [vmem:[%s3878_s1 + $0x20] sm:$0xff]  ;;  %v30_v8 = vld [vmem:[%s3878_s1 + $0x28] sm:$0xff] }
   0x3   :  { %v51_v9 = vand.u32 4294901760, %v28_v5  ;;  %v54_v10 = vand.u32 4294901760, %v29_v7  ;;  %v57_v11 = vand.u32 4294901760, %v30_v8  ;;  %v31_v12 = vld [vmem:[%s3878_s1 + $0x30] sm:$0xff]  ;;  %v32_v13 = vld [vmem:[%s3878_s1 + $0x38] sm:$0xff]  ;;  %v3569_v14 = vld [vmem:[%s3879_s0] sm:$0xff] }
   0x4   :  { %v3571_v15 = vpack.c.bf16 %v45_v4, %v42_v3  ;;  %v60_v16 = vand.u32 4294901760, %v31_v12  ;;  %v3576_v17 = vld [vmem:[%s3879_s0 + $0x8] sm:$0xff]  ;;  %v36_v18 = vsel %vm34_vm0, %v3569_v14, 0  ;;  %v63_v20 = vand.u32 4294901760, %v32_v13 }
   0x5   :  { %v3580_v19 = vpack.c.bf16 %v51_v9, %v48_v6  ;;  %v3582_v21 = vand.u32 4294901760, %v36_v18  ;;  %v3584_v22 = vsub.f32 %v25_v0, %v42_v3  ;;  %v3587_v23 = vpack.c.bf16 %v57_v11, %v54_v10 }
   0x6   :  { %3227 = vmatprep.subr.bf16.mxu0 %v3571_v15  ;;  %v3589_v24 = vsub.f32 %v26_v1, %v45_v4  ;;  %v39_v25 = vsel %vm34_vm0, %v3576_v17, 0  ;;  %v3593_v26 = vsub.f32 %v27_v2, %v48_v6  ;;  %v3602_v30 = vsub.f32 %v28_v5, %v51_v9 }
   0x7   :  { %3229 = vmatpush3.bf16.msra.mxu0 %v3571_v15  ;;  %v3597_v27 = vsub.f32 %v36_v18, %v3582_v21  ;;  %v137_v28 = vand.u32 4294901760, %v3584_v22  ;;  %v3600_v29 = vand.u32 4294901760, %v39_v25  ;;  %v3607_v33 = vsub.f32 %v29_v7, %v54_v10 }
   0x8   :  { %3231 = vmatprep.subr.bf16.mxu0 %v3580_v19  ;;  %v144_v31 = vand.u32 4294901760, %v3589_v24  ;;  %v151_v32 = vand.u32 4294901760, %v3593_v26  ;;  %v3609_v34 = vsub.f32 %v30_v8, %v57_v11  ;;  %v158_v38 = vand.u32 4294901760, %v3602_v30 }
   0x9   :  { %v116_v35 = vand.u32 4294901760, %v3597_v27  ;;  %v138_v36 = vsub.f32 %v3584_v22, %v137_v28  ;;  %v3616_v37 = vsub.f32 %v39_v25, %v3600_v29  ;;  %v165_v43 = vand.u32 4294901760, %v3607_v33 }
   0xa   :  { %v145_v39 = vsub.f32 %v3589_v24, %v144_v31  ;;  %v152_v40 = vsub.f32 %v3593_v26, %v151_v32  ;;  %v172_v44 = vand.u32 4294901760, %v3609_v34  ;;  %v3633_v45 = vpack.c.bf16 %v63_v20, %v60_v16 }
   0xb   :  { %3233 = vmatpush3.bf16.msra.mxu0 %v3580_v19  ;;  %v117_v41 = vsub.f32 %v3597_v27, %v116_v35  ;;  %v126_v42 = vand.u32 4294901760, %v3616_v37  ;;  %v139_v46 = vand.u32 4294901760, %v138_v36  ;;  %v159_v48 = vsub.f32 %v3602_v30, %v158_v38 }
   0xc   :  { %3235 = vmatprep.subr.bf16.mxu0 %v3587_v23  ;;  %v146_v47 = vand.u32 4294901760, %v145_v39  ;;  %v3638_v50 = vsub.f32 %v31_v12, %v60_v16  ;;  %v3643_v52 = vsub.f32 %v32_v13, %v63_v20  ;;  %v153_v53 = vand.u32 4294901760, %v152_v40  ;;  %v33_v16 = vld [vmem:[%s3880_s2] sm:$0x3] }
   0xd   :  { %v118_v49 = vand.u32 4294901760, %v117_v41  ;;  %v127_v51 = vsub.f32 %v3616_v37, %v126_v42  ;;  %v166_v54 = vsub.f32 %v3607_v33, %v165_v43  ;;  %v173_v55 = vsub.f32 %v3609_v34, %v172_v44 }
   0xe   :  { %v3653_v56 = vpack.c.bf16 %v146_v47, %v139_v46  ;;  %v160_v57 = vand.u32 4294901760, %v159_v48  ;;  %v179_v58 = vand.u32 4294901760, %v3638_v50  ;;  %v186_v59 = vand.u32 4294901760, %v3643_v52 }
   0xf   :  { %3237 = vmatpush3.bf16.msra.mxu0 %v3587_v23  ;;  %2912 = vmatprep.mubr.f32.mxu0 %v118_v49  ;;  %v128_v60 = vand.u32 4294901760, %v127_v51  ;;  %v167_v61 = vand.u32 4294901760, %v166_v54  ;;  %v174_v63 = vand.u32 4294901760, %v173_v55  ;;  %v3676_v6 = vpack.c.bf16 %v3589_v24, %v3584_v22 }
  0x10   :  { %3239 = vmatprep.subr.bf16.mxu0 %v3633_v45  ;;  %v3659_v62 = vpack.c.bf16 %v160_v57, %v153_v53  ;;  %v180_v0 = vsub.f32 %v3638_v50, %v179_v58  ;;  %v187_v1 = vsub.f32 %v3643_v52, %v186_v59  ;;  %v3682_v7 = vpack.c.bf16 %v3602_v30, %v3593_v26 }
  0x11   :  { %v3666_v2 = vpack.c.bf16 %v174_v63, %v167_v61  ;;  %v3690_v8 = vpack.c.bf16 %v3609_v34, %v3607_v33  ;;  %v3696_v9 = vpack.c.bf16 %v3643_v52, %v3638_v50  ;;  %v3715_v10 = vpack.c.bf16 %v144_v31, %v137_v28 }
  0x12   :  { %v181_v3 = vand.u32 4294901760, %v180_v0  ;;  %v188_v4 = vand.u32 4294901760, %v187_v1  ;;  %v3723_v11 = vpack.c.bf16 %v158_v38, %v151_v32  ;;  %v3734_v12 = vpack.c.bf16 %v172_v44, %v165_v43 }
  0x13   :  { %3241 = vmatpush3.bf16.msra.mxu0 %v3633_v45  ;;  %v3738_v13 = vpack.c.bf16 %v186_v59, %v179_v58  ;;  %v630_v18 = vsel %vm628_vm1, %v33_v16, 0  ;;  %v2682_v16 = vld [vmem:[%s3881_s5] sm:$0xff] }
  0x14   :  { %3243 = vmatprep.subr.bf16.mxu0 %v3653_v56  ;;  %v3670_v5 = vpack.c.bf16 %v188_v4, %v181_v3  ;;  %v3765_v20 = vand.u32 4294901760, %v630_v18 }
  0x16   :  { %2913 = vmatmul.mubr.f32.vlgmr.msra.gmra.mrb[0].mxu0 %v128_v60  ;;  %3010 = vmatprep.subr.mxu1 %v3765_v20 }
  0x17   :  { %3245 = vmatpush3.bf16.msra.mxu0 %v3653_v56  ;;  %2931 = vmatprep.mubr.f32.mxu0 %v3582_v21 }
  0x18   :  { %3247 = vmatprep.subr.bf16.mxu0 %v3659_v62  ;;  %3011 = vmatpush3.msra.mxu1 %v3765_v20 }
  0x1b   :  { %3249 = vmatpush3.bf16.msra.mxu0 %v3659_v62 }
  0x1c   :  { %3251 = vmatprep.subr.bf16.mxu0 %v3666_v2 }
  0x1f   :  { %3253 = vmatpush3.bf16.msra.mxu0 %v3666_v2 }
  0x20   :  { %3255 = vmatprep.subr.bf16.mxu0 %v3670_v5 }
  0x23   :  { %3257 = vmatpush3.bf16.msra.mxu0 %v3670_v5 }
  0x24   :  { %3259 = vmatprep.subr.bf16.mxu0 %v3676_v6 }
  0x26   :  { %2932 = vmatmul.mubr.f32.vlgmr.msra.gmra.mrb[0].mxu0 %v3600_v29 }
  0x27   :  { %3261 = vmatpush3.bf16.msra.mxu0 %v3676_v6  ;;  %2950 = vmatprep.mubr.f32.mxu0 %v3597_v27 }
  0x28   :  { %3263 = vmatprep.subr.bf16.mxu0 %v3682_v7 }
  0x2b   :  { %3265 = vmatpush3.bf16.msra.mxu0 %v3682_v7 }
  0x2c   :  { %3267 = vmatprep.subr.bf16.mxu0 %v3690_v8 }
  0x2f   :  { %3269 = vmatpush3.bf16.msra.mxu0 %v3690_v8 }
  0x30   :  { %3271 = vmatprep.subr.bf16.mxu0 %v3696_v9 }
  0x33   :  { %3273 = vmatpush3.bf16.msra.mxu0 %v3696_v9 }
  0x34   :  { %3275 = vmatprep.subr.bf16.mxu0 %v3571_v15 }
  0x36   :  { %2951 = vmatmul.mubr.f32.vlgmr.msra.gmra.mrb[0].mxu0 %v3616_v37 }
  0x37   :  { %3277 = vmatpush3.bf16.msra.mxu0 %v3571_v15  ;;  %2969 = vmatprep.mubr.f32.mxu0 %v116_v35 }
  0x38   :  { %3279 = vmatprep.subr.bf16.mxu0 %v3580_v19 }
  0x3b   :  { %3281 = vmatpush3.bf16.msra.mxu0 %v3580_v19 }
  0x3c   :  { %3283 = vmatprep.subr.bf16.mxu0 %v3587_v23 }
  0x3f   :  { %3285 = vmatpush3.bf16.msra.mxu0 %v3587_v23 }
  0x40   :  { %3287 = vmatprep.subr.bf16.mxu0 %v3633_v45 }
  0x43   :  { %3289 = vmatpush3.bf16.msra.mxu0 %v3633_v45 }
  0x44   :  { %3291 = vmatprep.subr.bf16.mxu0 %v3715_v10 }
  0x46   :  { %2970 = vmatmul.mubr.f32.vlgmr.msra.gmra.mrb[0].mxu0 %v126_v42 }
  0x47   :  { %3293 = vmatpush3.bf16.msra.mxu0 %v3715_v10  ;;  %2988 = vmatprep.mubr.f32.mxu0 %v3582_v21 }
  0x48   :  { %3295 = vmatprep.subr.bf16.mxu0 %v3723_v11 }
  0x4b   :  { %3297 = vmatpush3.bf16.msra.mxu0 %v3723_v11 }
  0x4c   :  { %3299 = vmatprep.subr.bf16.mxu0 %v3734_v12 }
  0x4f   :  { %3301 = vmatpush3.bf16.msra.mxu0 %v3734_v12 }
  0x50   :  { %3303 = vmatprep.subr.bf16.mxu0 %v3738_v13 }
  0x53   :  { %3305 = vmatpush3.bf16.msra.mxu0 %v3738_v13 }
  0x54   :  { %3307 = vmatprep.subr.bf16.mxu0 %v3571_v15 }
  0x56   :  { %2989 = vmatmul.mubr.f32.vlgmr.msra.gmra.mrb[0].mxu0 %v3600_v29 }
  0x57   :  { %3309 = vmatpush3.bf16.msra.mxu0 %v3571_v15  ;;  %3007 = vmatprep.mubr.f32.mxu0 %v3582_v21  ;;  %v3770_v21 = vsub.f32 %v630_v18, %v3765_v20 }
  0x58   :  { %3311 = vmatprep.subr.bf16.mxu0 %v3580_v19 }
  0x59   :  { %v3773_v22 = vand.u32 4294901760, %v3770_v21 }
  0x5b   :  { %3313 = vmatpush3.bf16.msra.mxu0 %v3580_v19  ;;  %v722_v24 = vsub.f32 %v3770_v21, %v3773_v22 }
  0x5c   :  { %3315 = vmatprep.subr.bf16.mxu0 %v3587_v23 }
  0x5d   :  { %v3777_v25 = vand.u32 4294901760, %v722_v24 }
  0x5f   :  { %3317 = vmatpush3.bf16.msra.mxu0 %v3587_v23  ;;  %3015 = vmatprep.subr.mxu1 %v3777_v25 }
  0x60   :  { %3319 = vmatprep.subr.bf16.mxu0 %v3633_v45 }
  0x63   :  { %3321 = vmatpush3.bf16.msra.mxu0 %v3633_v45 }
  0x64   :  { %3323 = vmatprep.subr.bf16.mxu0 %v3571_v15 }
  0x66   :  { %3008 = vmatmul.mubr.f32.vlgmr.msra.gmra.mrb[0].mxu0 %v3600_v29 }
  0x67   :  { %3325 = vmatpush3.bf16.msra.mxu0 %v3571_v15 }
  0x68   :  { %3327 = vmatprep.subr.bf16.mxu0 %v3580_v19 }
  0x6b   :  { %3329 = vmatpush3.bf16.msra.mxu0 %v3580_v19 }
  0x6c   :  { %3331 = vmatprep.subr.bf16.mxu0 %v3587_v23 }
  0x6f   :  { %3333 = vmatpush3.bf16.msra.mxu0 %v3587_v23 }
  0x70   :  { %3335 = vmatprep.subr.bf16.mxu0 %v3633_v45 }
  0x73   :  { %3337 = vmatpush3.bf16.msra.mxu0 %v3633_v45 }
  0x74   :  { %3159 = vmatprep.subr.mxu0 %v3777_v25 }
 0x139   :  { %v3009_v26 = vpop.f32.mrb[0].mxu0 }
 0x13a   :  { %v626_v27 = vsel %vm621_vm2, %v3009_v26, 0  ;;  %v611_v28 = vpop.f32.mrb[1].mxu0 }
 0x13b   :  { %v708_v29 = vand.u32 4294901760, %v626_v27  ;;  %v623_v30 = vsel %vm621_vm2, %v611_v28, 0 }
 0x13c   :  { %v698_v31 = vand.u32 4294901760, %v623_v30 }
 0x13d   :  { %v709_v32 = vsub.f32 %v626_v27, %v708_v29 }
 0x13e   :  { %v699_v33 = vsub.f32 %v623_v30, %v698_v31 }
 0x13f   :  { %v710_v34 = vand.u32 4294901760, %v709_v32 }
 0x140   :  { %v700_v35 = vand.u32 4294901760, %v699_v33 }
 0x141   :  { %v711_v36 = vsub.f32 %v709_v32, %v710_v34 }
 0x142   :  { %v701_v37 = vsub.f32 %v699_v33, %v700_v35 }
 0x143   :  { %v712_v39 = vand.u32 4294901760, %v711_v36 }
 0x144   :  { %v702_v38 = vand.u32 4294901760, %v701_v37 }
 0x146   :  { %3012 = vmatprep.mubr.f32.mxu1 %v702_v38 }
 0x147   :  { %3013 = vmatmul.mubr.f32.vlgmr.msra.gmra.mrb[0].mxu1 %v712_v39 }
 0x148   :  { %3017 = vmatprep.mubr.f32.mxu1 %v698_v31  ;;  %3016 = vmatpush3.msra.mxu1 %v3777_v25 }
 0x149   :  { %3020 = vmatprep.subr.mxu1 %v3770_v21 }
 0x14f   :  { %3018 = vmatmul.mubr.f32.vlgmr.msra.gmra.mrb[0].mxu1 %v708_v29 }
 0x150   :  { %3022 = vmatprep.mubr.f32.mxu1 %v699_v33  ;;  %3021 = vmatpush3.msra.mxu1 %v3770_v21 }
 0x151   :  { %3025 = vmatprep.subr.mxu1 %v3765_v20 }
 0x157   :  { %3023 = vmatmul.mubr.f32.vlgmr.msra.gmra.mrb[0].mxu1 %v709_v32 }
 0x158   :  { %3027 = vmatprep.mubr.f32.mxu1 %v700_v35  ;;  %3026 = vmatpush3.msra.mxu1 %v3765_v20 }
 0x159   :  { %3030 = vmatprep.subr.mxu1 %v3773_v22 }
 0x15f   :  { %3028 = vmatmul.mubr.f32.vlgmr.msra.gmra.mrb[0].mxu1 %v710_v34 }
 0x160   :  { %3032 = vmatprep.mubr.f32.mxu1 %v698_v31  ;;  %3031 = vmatpush3.msra.mxu1 %v3773_v22 }
 0x161   :  { %3035 = vmatprep.subr.mxu1 %v3765_v20 }
 0x167   :  { %3033 = vmatmul.mubr.f32.vlgmr.msra.gmra.mrb[0].mxu1 %v708_v29 }
 0x168   :  { %3037 = vmatprep.mubr.f32.mxu1 %v698_v31  ;;  %3036 = vmatpush3.msra.mxu1 %v3765_v20 }
 0x169   :  { %3339 = vmatprep.subr.bf16.mxu1 %v3653_v56 }
 0x16f   :  { %3038 = vmatmul.mubr.f32.vlgmr.msra.gmra.mrb[0].mxu1 %v708_v29 }
 0x170   :  { %3341 = vmatpush3.bf16.msra.mxu1 %v3653_v56 }
 0x171   :  { %3343 = vmatprep.subr.bf16.mxu1 %v3659_v62 }
 0x174   :  { %3345 = vmatpush3.bf16.msra.mxu1 %v3659_v62 }
 0x175   :  { %3347 = vmatprep.subr.bf16.mxu1 %v3666_v2 }
 0x178   :  { %3349 = vmatpush3.bf16.msra.mxu1 %v3666_v2 }
 0x179   :  { %3351 = vmatprep.subr.bf16.mxu1 %v3670_v5 }
 0x17c   :  { %3353 = vmatpush3.bf16.msra.mxu1 %v3670_v5 }
 0x17d   :  { %3355 = vmatprep.subr.bf16.mxu1 %v3676_v6 }
 0x242   :  { %v3039_v40 = vpop.f32.mrb[0].mxu1 }
 0x243   :  { %v3802_v41 = vsub.f32 %v3576_v17, %v3039_v40  ;;  %v1111_v42 = vpop.f32.mrb[1].mxu1 }
 0x244   :  { %v3805_v43 = vsub.f32 %v3569_v14, %v1111_v42 }
 0x245   :  { %v1124_v44 = vmul.f32 %v3802_v41, %v3802_v41 }
 0x246   :  { %v1123_v46 = vmul.f32 %v3805_v43, %v3805_v43 }
 0x247   :  { %v1129_v47 = vsel %vm34_vm0, %v1124_v44, 0 }
 0x248   :  { %v1214_v48 = vand.u32 4294901760, %v1129_v47  ;;  %v1126_v49 = vsel %vm34_vm0, %v1123_v46, 0 }
 0x249   :  { %v1204_v50 = vand.u32 4294901760, %v1126_v49 }
 0x24a   :  { %v1215_v51 = vsub.f32 %v1129_v47, %v1214_v48 }
 0x24b   :  { %3075 = vmatprep.mubr.f32.mxu1 %v1204_v50  ;;  %v1205_v17 = vsub.f32 %v1126_v49, %v1204_v50 }
 0x24c   :  { %3076 = vmatmul.mubr.f32.vlgmr.msra.gmra.mrb[2].mxu1 %v1214_v48  ;;  %v1216_v52 = vand.u32 4294901760, %v1215_v51 }
 0x24d   :  { %3357 = vmatpush3.bf16.msra.mxu1 %v3676_v6  ;;  %3094 = vmatprep.mubr.f32.mxu1 %v1205_v17  ;;  %v1206_v14 = vand.u32 4294901760, %v1205_v17 }
 0x24e   :  { %3359 = vmatprep.subr.bf16.mxu1 %v3682_v7  ;;  %v1217_v53 = vsub.f32 %v1215_v51, %v1216_v52 }
 0x24f   :  { %v1207_v54 = vsub.f32 %v1205_v17, %v1206_v14 }
 0x250   :  { %v1218_v56 = vand.u32 4294901760, %v1217_v53 }
 0x251   :  { %3361 = vmatpush3.bf16.msra.mxu1 %v3682_v7  ;;  %v1208_v55 = vand.u32 4294901760, %v1207_v54 }
 0x252   :  { %3363 = vmatprep.subr.bf16.mxu1 %v3690_v8 }
 0x253   :  { %3056 = vmatprep.mubr.f32.mxu0 %v1208_v55 }
 0x254   :  { %3057 = vmatmul.mubr.f32.vlgmr.msra.gmra.mrb[2].mxu0 %v1218_v56 }
 0x255   :  { %3365 = vmatpush3.bf16.msra.mxu1 %v3690_v8  ;;  %3160 = vmatpush3.msra.mxu0 %v3777_v25 }
 0x256   :  { %3367 = vmatprep.subr.bf16.mxu1 %v3696_v9  ;;  %3164 = vmatprep.subr.mxu0 %v3770_v21 }
 0x259   :  { %3369 = vmatpush3.bf16.msra.mxu1 %v3696_v9 }
 0x25a   :  { %3371 = vmatprep.subr.bf16.mxu1 %v3571_v15 }
 0x25c   :  { %3095 = vmatmul.mubr.f32.vlgmr.msra.gmra.mrb[2].mxu1 %v1215_v51 }
 0x25d   :  { %3373 = vmatpush3.bf16.msra.mxu1 %v3571_v15  ;;  %3113 = vmatprep.mubr.f32.mxu1 %v1206_v14 }
 0x25e   :  { %3375 = vmatprep.subr.bf16.mxu1 %v3580_v19 }
 0x261   :  { %3377 = vmatpush3.bf16.msra.mxu1 %v3580_v19 }
 0x262   :  { %3379 = vmatprep.subr.bf16.mxu1 %v3587_v23 }
 0x265   :  { %3381 = vmatpush3.bf16.msra.mxu1 %v3587_v23 }
 0x266   :  { %3383 = vmatprep.subr.bf16.mxu1 %v3633_v45 }
 0x269   :  { %3385 = vmatpush3.bf16.msra.mxu1 %v3633_v45 }
 0x26a   :  { %3387 = vmatprep.subr.bf16.mxu1 %v3715_v10 }
 0x26c   :  { %3114 = vmatmul.mubr.f32.vlgmr.msra.gmra.mrb[2].mxu1 %v1216_v52 }
 0x26d   :  { %3389 = vmatpush3.bf16.msra.mxu1 %v3715_v10  ;;  %3132 = vmatprep.mubr.f32.mxu1 %v1204_v50 }
 0x26e   :  { %3391 = vmatprep.subr.bf16.mxu1 %v3723_v11 }
 0x271   :  { %3393 = vmatpush3.bf16.msra.mxu1 %v3723_v11  ;;  %v3502_v11 = vmov 0.0|0.0  }
 0x272   :  { %3395 = vmatprep.subr.bf16.mxu1 %v3734_v12 }
 0x275   :  { %3397 = vmatpush3.bf16.msra.mxu1 %v3734_v12  ;;  %v3504_v12 = vmov 0.0  }
 0x276   :  { %3399 = vmatprep.subr.bf16.mxu1 %v3738_v13 }
 0x279   :  { %3401 = vmatpush3.bf16.msra.mxu1 %v3738_v13  ;;  %v3505_v13 = vmov 0  }
 0x27a   :  { %3403 = vmatprep.subr.bf16.mxu1 %v3571_v15  ;;  %3493 = vset.pattern.permute.xlu0 %v3505_v13 }
 0x27b   :  { %2685 = vperm.xlu0 %3493, %v2682_v16  }
 0x27c   :  { %3133 = vmatmul.mubr.f32.vlgmr.msra.gmra.mrb[2].mxu1 %v1214_v48 }
 0x27d   :  { %3405 = vmatpush3.bf16.msra.mxu1 %v3571_v15  ;;  %3151 = vmatprep.mubr.f32.mxu1 %v1204_v50  ;;  %v2721_v50 = vld [vmem:[%s3883_s3] ss:$0 sm:$0xff] }
 0x27e   :  { %3407 = vmatprep.subr.bf16.mxu1 %v3580_v19 }
 0x281   :  { %3409 = vmatpush3.bf16.msra.mxu1 %v3580_v19 }
 0x282   :  { %3411 = vmatprep.subr.bf16.mxu1 %v3587_v23 }
 0x285   :  { %3413 = vmatpush3.bf16.msra.mxu1 %v3587_v23 }
 0x286   :  { %3415 = vmatprep.subr.bf16.mxu1 %v3633_v45 }
 0x289   :  { %3417 = vmatpush3.bf16.msra.mxu1 %v3633_v45 }
 0x28a   :  { %3154 = vmatprep.subr.mxu1 %v3765_v20 }
 0x28c   :  { %3152 = vmatmul.mubr.f32.vlgmr.msra.gmra.mrb[2].mxu1 %v1214_v48 }
 0x28d   :  { %3155 = vmatpush3.msra.mxu1 %v3765_v20 }
 0x28e   :  { %3418 = vmatprep.subr.bf16.mxu1 %v3502_v11 }
 0x2fa   :  { %v2686_v17 = vpop.permute.xlu0 %2685 }
 0x327   :  { %v3058_v57 = vpop.f32.mrb[2].mxu0 }
 0x328   :  { %v1210_v15 = vpop.f32.mrb[3].mxu0  ;;  %v1221_v58 = vadd.f32 1e-05, %v3058_v57 }
 0x329   :  { %v1211_v59 = vadd.f32 1e-05, %v1210_v15 }
 0x35f   :  { %v3153_v60 = vpop.f32.mrb[2].mxu1 }
 0x360   :  { %v3437_v61 = vadd.f32 %v3153_v60, %v1221_v58  ;;  %v1701_v19 = vpop.f32.mrb[3].mxu1 }
 0x361   :  { %v3439_v62 = vadd.f32 %v1701_v19, %v1211_v59 }
 0x362   :  { %3494 = vrsqrt.f32 %v3437_v61 }
 0x363   :  { %3496 = vrsqrt.f32 %v3439_v62 }
 0x36c   :  { %v3495_v23 = vpop.eup %3494 }
 0x36d   :  { %v3497_v63 = vpop.eup %3496  ;;  %v1717_v0 = vsel %vm621_vm2, %v3495_v23, 0 }
 0x36e   :  { %v1714_v45 = vsel %vm621_vm2, %v3497_v63, 0  ;;  %v1795_v1 = vand.u32 4294901760, %v1717_v0 }
 0x36f   :  { %v1785_v2 = vand.u32 4294901760, %v1714_v45 }
 0x370   :  { %v1796_v3 = vsub.f32 %v1717_v0, %v1795_v1 }
 0x371   :  { %3161 = vmatprep.mubr.f32.mxu0 %v1785_v2  ;;  %v1786_v4 = vsub.f32 %v1714_v45, %v1785_v2 }
 0x372   :  { %3162 = vmatmul.mubr.f32.vlgmr.msra.gmra.mrb[4].mxu0 %v1795_v1  ;;  %v1797_v5 = vand.u32 4294901760, %v1796_v3 }
 0x373   :  { %3166 = vmatprep.mubr.f32.mxu0 %v1786_v4  ;;  %3165 = vmatpush3.msra.mxu0 %v3770_v21  ;;  %v1787_v6 = vand.u32 4294901760, %v1786_v4 }
 0x374   :  { %v1798_v7 = vsub.f32 %v1796_v3, %v1797_v5  ;;  %3169 = vmatprep.subr.mxu0 %v3765_v20 }
 0x375   :  { %v1788_v8 = vsub.f32 %v1786_v4, %v1787_v6 }
 0x376   :  { %v1799_v10 = vand.u32 4294901760, %v1798_v7 }
 0x377   :  { %v1789_v9 = vand.u32 4294901760, %v1788_v8 }
 0x379   :  { %3156 = vmatprep.mubr.f32.mxu1 %v1789_v9 }
 0x37a   :  { %3157 = vmatmul.mubr.f32.vlgmr.msra.gmra.mrb[4].mxu1 %v1799_v10  ;;  %3167 = vmatmul.mubr.f32.vlgmr.msra.gmra.mrb[4].mxu0 %v1796_v3 }
 0x37b   :  { %3171 = vmatprep.mubr.f32.mxu0 %v1787_v6  ;;  %3170 = vmatpush3.msra.mxu0 %v3765_v20  ;;  %v3506_v6 = vmov 1.0  }
 0x37c   :  { %3174 = vmatprep.subr.mxu0 %v3773_v22  ;;  %3188 = vmatprep.mubr.msk.f32.mxu1 %vm3503_vm3, %v3504_v12 }
 0x382   :  { %3172 = vmatmul.mubr.f32.vlgmr.msra.gmra.mrb[4].mxu0 %v1797_v5 }
 0x383   :  { %3176 = vmatprep.mubr.f32.mxu0 %v1785_v2  ;;  %3175 = vmatpush3.msra.mxu0 %v3773_v22 }
 0x384   :  { %3179 = vmatprep.subr.mxu0 %v3765_v20 }
 0x38a   :  { %3177 = vmatmul.mubr.f32.vlgmr.msra.gmra.mrb[4].mxu0 %v1795_v1 }
 0x38b   :  { %3181 = vmatprep.mubr.f32.mxu0 %v1785_v2  ;;  %3180 = vmatpush3.msra.mxu0 %v3765_v20  ;;  %v2210_v20 = vld [vmem:[%s3882_s4] sm:$0xff] }
 0x38c   :  { %v2213_v22 = vsel %vm2211_vm4, %v2210_v20, 0 }
 0x38d   :  { %v2282_v24 = vand.u32 4294901760, %v2213_v22 }
 0x38f   :  { %v2283_v25 = vsub.f32 %v2213_v22, %v2282_v24 }
 0x391   :  { %v2284_v29 = vand.u32 4294901760, %v2283_v25 }
 0x392   :  { %3182 = vmatmul.mubr.f32.vlgmr.msra.gmra.mrb[4].mxu0 %v1795_v1 }
 0x393   :  { %v2285_v34 = vsub.f32 %v2283_v25, %v2284_v29 }
 0x395   :  { %v2286_v40 = vand.u32 4294901760, %v2285_v34 }
 0x44d   :  { %v3158_v18 = vpop.f32.mrb[4].mxu1 }
 0x44e   :  { %v1791_v21 = vpop.f32.mrb[5].mxu1 }
 0x465   :  { %v3183_v26 = vpop.f32.mrb[4].mxu0 }
 0x466   :  { %v3440_v27 = vadd.f32 %v3183_v26, %v3158_v18  ;;  %v2198_v28 = vpop.f32.mrb[5].mxu0 }
 0x467   :  { %v3441_v30 = vadd.f32 %v2198_v28, %v1791_v21 }
 0x468   :  { %v2209_v31 = vmul.f32 %v3440_v27, %v3802_v41 }
 0x469   :  { %v2208_v32 = vmul.f32 %v3441_v30, %v3805_v43 }
 0x46a   :  { %v2219_v33 = vand.u32 4294901760, %v2209_v31 }
 0x46b   :  { %v2216_v35 = vand.u32 4294901760, %v2208_v32 }
 0x46c   :  { %v2301_v36 = vsub.f32 %v2209_v31, %v2219_v33 }
 0x46d   :  { %v3419_v37 = vpack.c.bf16 %v2219_v33, %v2216_v35  ;;  %v2294_v38 = vsub.f32 %v2208_v32, %v2216_v35 }
 0x46e   :  { %v2302_v39 = vand.u32 4294901760, %v2301_v36 }
 0x46f   :  { %v2295_v42 = vand.u32 4294901760, %v2294_v38  ;;  %3420 = vmatpush3.bf16.msra.mxu1 %v3419_v37  ;;  %v3425_v44 = vpack.c.bf16 %v2301_v36, %v2294_v38 }
 0x470   :  { %v2303_v46 = vsub.f32 %v2301_v36, %v2302_v39  ;;  %3421 = vmatprep.subr.bf16.mxu1 %v3502_v11 }
 0x471   :  { %v2296_v47 = vsub.f32 %v2294_v38, %v2295_v42  ;;  %v3431_v48 = vpack.c.bf16 %v2302_v39, %v2295_v42 }
 0x472   :  { %3189 = vmatmul.mubr.f32.vlgmr.msra.gmra.mrb[6].mxu1 %v2286_v40  ;;  %v2304_v49 = vand.u32 4294901760, %v2303_v46 }
 0x473   :  { %v2297_v41 = vand.u32 4294901760, %v2296_v47  ;;  %3195 = vmatprep.mubr.msk.f32.mxu1 %vm3503_vm3, %v3504_v12 }
 0x475   :  { %v3422_v43 = vpack.c.bf16 %v2304_v49, %v2297_v41 }
 0x477   :  { %3423 = vmatpush3.bf16.msra.mxu1 %v3422_v43 }
 0x478   :  { %3424 = vmatprep.subr.bf16.mxu1 %v3502_v11 }
 0x47a   :  { %3196 = vmatmul.mubr.f32.vlgmr.msra.gmra.mrb[6].mxu1 %v2282_v24 }
 0x47b   :  { %3426 = vmatpush3.bf16.msra.mxu1 %v3425_v44  ;;  %3202 = vmatprep.mubr.msk.f32.mxu1 %vm3503_vm3, %v3504_v12 }
 0x47c   :  { %3427 = vmatprep.subr.bf16.mxu1 %v3502_v11 }
 0x482   :  { %3203 = vmatmul.mubr.f32.vlgmr.msra.gmra.mrb[6].mxu1 %v2283_v25 }
 0x483   :  { %3429 = vmatpush3.bf16.msra.mxu1 %v3419_v37  ;;  %3209 = vmatprep.mubr.msk.f32.mxu1 %vm3503_vm3, %v3504_v12 }
 0x484   :  { %3430 = vmatprep.subr.bf16.mxu1 %v3502_v11 }
 0x48a   :  { %3210 = vmatmul.mubr.f32.vlgmr.msra.gmra.mrb[6].mxu1 %v2284_v29 }
 0x48b   :  { %3432 = vmatpush3.bf16.msra.mxu1 %v3431_v48  ;;  %3216 = vmatprep.mubr.msk.f32.mxu1 %vm3503_vm3, %v3504_v12 }
 0x48c   :  { %3433 = vmatprep.subr.bf16.mxu1 %v3502_v11 }
 0x492   :  { %3217 = vmatmul.mubr.f32.vlgmr.msra.gmra.mrb[6].mxu1 %v2282_v24 }
 0x493   :  { %3435 = vmatpush3.bf16.msra.mxu1 %v3419_v37  ;;  %3223 = vmatprep.mubr.msk.f32.mxu1 %vm3503_vm3, %v3504_v12 }
 0x49a   :  { %3224 = vmatmul.mubr.f32.vlgmr.msra.gmra.mrb[6].mxu1 %v2282_v24 }
 0x56d   :  { %v2670_v51 = vpop.f32.mrb[6].mxu1 }
 0x56e   :  { %v2681_v52 = vmul.f32 %v2721_v50, %v2670_v51  ;;  %v3225_v14 = vpop.f32.mrb[7].mxu1 }
 0x570   :  { %v2688_v53 = vadd.f32 %v2686_v17, %v2681_v52 }
 0x572   :  { %v2690_v54 = vmul.f32 0.70710677, %v2688_v53  ;;  %v2689_v9 = vmul.f32 0.5, %v2688_v53 }
 0x574   :  { %v2693_v55 = vand.u32 2147483647, %v2690_v54  ;;  %vm2691_vm5 = vcmp.lt.f32.partialorder %v2690_v54, 0.0 }
 0x575   :  { %v2692_v7 = vsel %vm2691_vm5, -1.0, %v3506_v6 }
 0x576   :  { %v2694_v56 = vmul.f32 0.3275911, %v2693_v55  ;;  %v2707_v15 = vsub.f32 0.0, %v2693_v55 }
 0x578   :  { %v2695_v57 = vadd.f32 1.0, %v2694_v56  ;;  %v2708_v59 = vmul.f32 %v2707_v15, %v2693_v55 }
 0x57a   :  { %3498 = vrcp.f32 %v2695_v57  ;;  %v2709_v19 = vmul.f32 1.442695, %v2708_v59 }
 0x57c   :  { %3500 = vpow2.f32 %v2709_v19 }
 0x584   :  { %v3499_v58 = vpop.eup %3498 }
 0x585   :  { %v2698_v60 = vmul.f32 1.0614054, %v3499_v58 }
 0x586   :  { %v3501_v3 = vpop.eup %3500 }
 0x587   :  { %v2699_v61 = vadd.f32 -1.4531521, %v2698_v60 }
 0x589   :  { %v2700_v62 = vmul.f32 %v3499_v58, %v2699_v61 }
 0x58b   :  { %v2701_v23 = vadd.f32 1.4214138, %v2700_v62 }
 0x58d   :  { %v2702_v63 = vmul.f32 %v3499_v58, %v2701_v23 }
 0x58f   :  { %v2703_v0 = vadd.f32 -0.28449672, %v2702_v63 }
 0x591   :  { %v2704_v45 = vmul.f32 %v3499_v58, %v2703_v0 }
 0x593   :  { %v2705_v1 = vadd.f32 0.2548296, %v2704_v45 }
 0x595   :  { %v2706_v2 = vmul.f32 %v3499_v58, %v2705_v1 }
 0x597   :  { %v2711_v4 = vmul.f32 %v3501_v3, %v2706_v2 }
 0x599   :  { %v2712_v5 = vsub.f32 1.0, %v2711_v4 }
 0x59b   :  { %v2713_v8 = vmul.f32 %v2712_v5, %v2692_v7 }
 0x59d   :  { %v2714_v10 = vadd.f32 1.0, %v2713_v8 }
 0x59f   :  { %v2715_v11 = vmul.f32 %v2714_v10, %v2689_v9 }
 0x5a1   :  { %2716 = vst.msk [vmem:[%s3884_s6] sm:$0xff] %vm34_vm0, %v2715_v11 }

</bundles_post_ra>
